<compile_context>
chip_gen: v6e
topology: v6e:2x2x1
jax: 0.10.0
libtpu: 0.0.40
codegen_flags: <defaults>
</compile_context>

<pallas_src>
import functools

import jax
import jax.numpy as jnp
from jax.experimental import pallas as pl
from jax.experimental.pallas import tpu as pltpu


def _round_up(n, m):
    return ((n + m - 1) // m) * m


def _pick_tile_b(batch):
    """>=2 balanced tiles when the batch allows it (v7x megacore), <=~1024 rows
    per tile, multiple of 8 rows, minimal last-tile padding."""
    if batch <= 8:
        return 8
    n_tiles = max(2, pl.cdiv(batch, 1024))
    return _round_up(pl.cdiv(batch, n_tiles), 8)


def _encoder_kernel(num_layers, softmax_final, norm_final, *refs):
    """refs = (x_ref, w0_ref, b0_ref, ..., w{L-1}_ref, b{L-1}_ref, o_ref).

    Weights are (in, out), already transposed and zero-padded on the internal
    (hidden) dims only; biases are (1, out).  Padded hidden lanes stay exactly
    zero through Linear+ReLU and contribute nothing downstream.
    """
    x_ref = refs[0]
    o_ref = refs[-1]
    h = x_ref[...]  # f32, (TILE_B, in_dim)
    for l in range(num_layers):
        w = refs[1 + 2 * l][...]   # (in_l, out_l)
        b = refs[2 + 2 * l][...]   # (1, out_l)
        h = jnp.dot(h, w, preferred_element_type=jnp.float32) + b
        if l == num_layers - 1:
            if softmax_final:
                # F.log_softmax along dim=1 (true out_dim -> no mask needed).
                m = jnp.max(h, axis=-1, keepdims=True)
                z = h - m
                lse = jnp.log(jnp.sum(jnp.exp(z), axis=-1, keepdims=True))
                h = z - lse
            elif norm_final:
                # F.normalize: x / max(||x||_2, 1e-12) along dim=1.
                sumsq = jnp.sum(h * h, axis=-1, keepdims=True)
                inv = jax.lax.rsqrt(jnp.maximum(sumsq, 1e-24))  # EUP, not VALU divide
                h = h * inv
        else:
            h = jnp.maximum(h, 0.0)  # ReLU
    o_ref[...] = h.astype(o_ref.dtype)


def prepare_encoder_params(weights, biases):
    """One-time parameter prep (do this at load/init, NOT per forward).

    weights[l]: (out_l, in_l) PyTorch layout; biases[l]: (out_l,).
    Returns [(w_t, b_row), ...] with w_t: (in_l_pad, out_l_pad) f32 and
    b_row: (1, out_l_pad) f32.  Only internal hidden dims are padded to 128;
    the input dim (first K) and output dim (last N) keep their true widths so
    x/out stream from/to HBM without lane amplification.
    """
    num_layers = len(weights)
    assert num_layers >= 1 and len(biases) == num_layers
    dims = [weights[0].shape[1]] + [w.shape[0] for w in weights]
    dims_pad = list(dims)
    for i in range(1, num_layers):          # hidden dims only
        dims_pad[i] = _round_up(dims[i], 128)

    packed = []
    for l, (w, b) in enumerate(zip(weights, biases)):
        k, n = dims[l], dims[l + 1]
        k_pad, n_pad = dims_pad[l], dims_pad[l + 1]
        wt = jnp.zeros((k_pad, n_pad), jnp.float32)
        wt = wt.at[:k, :n].set(jnp.asarray(w, jnp.float32).T)
        bp = jnp.zeros((1, n_pad), jnp.float32)
        bp = bp.at[0, :n].set(jnp.asarray(b, jnp.float32))
        packed.append((wt, bp))
    return packed


def encoder_forward(x, packed_params, softmax_final=False, norm_final=True):
    """x: (B, input_size) f32; packed_params from prepare_encoder_params()."""
    num_layers = len(packed_params)
    batch, in_dim = x.shape
    assert packed_params[0][0].shape[0] == in_dim
    out_dim = packed_params[-1][0].shape[1]

    tile_b = _pick_tile_b(batch)
    batch_pad = _round_up(batch, tile_b)
    grid = (batch_pad // tile_b,)

    x = jnp.asarray(x, jnp.float32)
    if batch_pad != batch:
        # Row-only padding (at most a few rows); no lane padding.
        x = jnp.pad(x, ((0, batch_pad - batch), (0, 0)))

    args = [x]
    # x streams through VMEM, one batch tile per grid step; full (true) lane width.
    in_specs = [pl.BlockSpec((tile_b, in_dim), lambda i: (i, 0))]
    for wt, bp in packed_params:
        args.append(wt)
        args.append(bp)
        # Weights/biases stay VMEM-resident across all batch tiles.
        in_specs.append(pl.BlockSpec(wt.shape, lambda i: (0, 0)))
        in_specs.append(pl.BlockSpec(bp.shape, lambda i: (0, 0)))

    kernel = functools.partial(_encoder_kernel, num_layers, softmax_final, norm_final)

    out = pl.pallas_call(
        kernel,
        out_shape=jax.ShapeDtypeStruct((batch_pad, out_dim), jnp.float32),
        grid=grid,
        in_specs=in_specs,
        out_specs=pl.BlockSpec((tile_b, out_dim), lambda i: (i, 0)),
        compiler_params=pltpu.CompilerParams(
            dimension_semantics=("parallel",),  # shards batch tiles across TCs on v7x
        ),
    )(*args)

    return out[:batch] if batch_pad != batch else out


def _reference_forward(x, weights, biases, softmax_final=False, norm_final=True):
    """Pure-JAX reference matching the PyTorch module semantics."""
    h = x
    num_layers = len(weights)
    for l in range(num_layers):
        h = h @ weights[l].T + biases[l]
        if l == num_layers - 1:
            if softmax_final:
                h = jax.nn.log_softmax(h, axis=1)
            elif norm_final:
                nrm = jnp.sqrt(jnp.sum(h * h, axis=1, keepdims=True))
                h = h / jnp.maximum(nrm, 1e-12)
        else:
            h = jnp.maximum(h, 0.0)
    return h


if __name__ == "__main__":
    # Encoder(input_size=32, hidden_sizes=[64, 48], output_size=16,
    #         softmax_final=False, norm_final=True)
    input_size = 32
    hidden_sizes = [64, 48]
    output_size = 16
    batch = 8

    layer_dims = [input_size] + hidden_sizes + [output_size]

    key = jax.random.PRNGKey(0)
    keys = jax.random.split(key, 2 * (len(layer_dims) - 1) + 1)
    x = jax.random.normal(keys[0], (batch, input_size), dtype=jnp.float32)

    weights, biases = [], []
    for l in range(len(layer_dims) - 1):
        in_d, out_d = layer_dims[l], layer_dims[l + 1]
        wk, bk = keys[1 + 2 * l], keys[2 + 2 * l]
        bound = 1.0 / jnp.sqrt(jnp.float32(in_d))
        weights.append(jax.random.uniform(wk, (out_d, in_d), jnp.float32, -bound, bound))
        biases.append(jax.random.uniform(bk, (out_d,), jnp.float32, -bound, bound))

    # One-time parameter prep (transpose + internal-dim pad), reused per forward.
    packed = prepare_encoder_params(weights, biases)

    out = encoder_forward(x, packed, softmax_final=False, norm_final=True)
    out = jax.block_until_ready(out)

    ref = _reference_forward(x, weights, biases, softmax_final=False, norm_final=True)
    assert out.shape == (batch, output_size)
    assert jnp.allclose(out, ref, atol=1e-5, rtol=1e-5), "mismatch vs reference (norm)"

    # Also exercise the log-softmax path.
    out_sm = encoder_forward(x, packed, softmax_final=True, norm_final=False)
    out_sm = jax.block_until_ready(out_sm)
    ref_sm = _reference_forward(x, weights, biases, softmax_final=True, norm_final=False)
    assert jnp.allclose(out_sm, ref_sm, atol=1e-5, rtol=1e-5), "mismatch vs reference (softmax)"

    print("KERNEL_OK")
</pallas_src>

<mosaic_0001>
module attributes {stable_mosaic.version = 11 : i64} {
  func.func @_encoder_kernel(%arg0: i32, %arg1: memref<8x32xf32, #tpu.memory_space<vmem>>, %arg2: memref<32x128xf32, #tpu.memory_space<vmem>>, %arg3: memref<1x128xf32, #tpu.memory_space<vmem>>, %arg4: memref<128x128xf32, #tpu.memory_space<vmem>>, %arg5: memref<1x128xf32, #tpu.memory_space<vmem>>, %arg6: memref<128x16xf32, #tpu.memory_space<vmem>>, %arg7: memref<1x16xf32, #tpu.memory_space<vmem>>, %arg8: memref<8x16xf32, #tpu.memory_space<vmem>>) attributes {dimension_semantics = [#tpu.dimension_semantics<parallel>], iteration_bounds = array<i64: 1>, scalar_prefetch = 0 : i64, scratch_operands = 0 : i64, tpu.core_type = #tpu.core_type<tc>, window_params = [{transform_indices = @transform_0, window_bounds = array<i64: 8, 32>}, {pipeline_mode = #tpu.pipeline_mode<synchronous>, transform_indices = @transform_1, window_bounds = array<i64: 32, 128>}, {pipeline_mode = #tpu.pipeline_mode<synchronous>, transform_indices = @transform_2, window_bounds = array<i64: 1, 128>}, {pipeline_mode = #tpu.pipeline_mode<synchronous>, transform_indices = @transform_3, window_bounds = array<i64: 128, 128>}, {pipeline_mode = #tpu.pipeline_mode<synchronous>, transform_indices = @transform_4, window_bounds = array<i64: 1, 128>}, {pipeline_mode = #tpu.pipeline_mode<synchronous>, transform_indices = @transform_5, window_bounds = array<i64: 128, 16>}, {pipeline_mode = #tpu.pipeline_mode<synchronous>, transform_indices = @transform_6, window_bounds = array<i64: 1, 16>}, {transform_indices = @transform_7, window_bounds = array<i64: 8, 16>}]} {
    %c0 = arith.constant 0 : index
    %c0_0 = arith.constant 0 : index
    %0 = vector.load %arg1[%c0, %c0_0] : memref<8x32xf32, #tpu.memory_space<vmem>>, vector<8x32xf32>
    %c0_1 = arith.constant 0 : index
    %c0_2 = arith.constant 0 : index
    %1 = vector.load %arg2[%c0_1, %c0_2] : memref<32x128xf32, #tpu.memory_space<vmem>>, vector<32x128xf32>
    %c0_3 = arith.constant 0 : index
    %c0_4 = arith.constant 0 : index
    %2 = vector.load %arg3[%c0_3, %c0_4] : memref<1x128xf32, #tpu.memory_space<vmem>>, vector<1x128xf32>
    %cst = arith.constant dense<0.000000e+00> : vector<8x128xf32>
    %3 = tpu.matmul %0, %1, %cst {dimension_numbers = #tpu.dot_dimension_numbers<[1], [0], [0], [1], [0, 0, 1, 1], [], []>} : vector<8x32xf32>, vector<32x128xf32>, vector<8x128xf32> -> vector<8x128xf32>
    %4 = vector.broadcast %2 : vector<1x128xf32> to vector<8x128xf32>
    %5 = arith.addf %3, %4 : vector<8x128xf32>
    %cst_5 = arith.constant 0.000000e+00 : f32
    %6 = vector.broadcast %cst_5 : f32 to vector<8x128xf32>
    %7 = arith.maximumf %5, %6 : vector<8x128xf32>
    %c0_6 = arith.constant 0 : index
    %c0_7 = arith.constant 0 : index
    %8 = vector.load %arg4[%c0_6, %c0_7] : memref<128x128xf32, #tpu.memory_space<vmem>>, vector<128x128xf32>
    %c0_8 = arith.constant 0 : index
    %c0_9 = arith.constant 0 : index
    %9 = vector.load %arg5[%c0_8, %c0_9] : memref<1x128xf32, #tpu.memory_space<vmem>>, vector<1x128xf32>
    %cst_10 = arith.constant dense<0.000000e+00> : vector<8x128xf32>
    %10 = tpu.matmul %7, %8, %cst_10 {dimension_numbers = #tpu.dot_dimension_numbers<[1], [0], [0], [1], [0, 0, 1, 1], [], []>} : vector<8x128xf32>, vector<128x128xf32>, vector<8x128xf32> -> vector<8x128xf32>
    %11 = vector.broadcast %9 : vector<1x128xf32> to vector<8x128xf32>
    %12 = arith.addf %10, %11 : vector<8x128xf32>
    %cst_11 = arith.constant 0.000000e+00 : f32
    %13 = vector.broadcast %cst_11 : f32 to vector<8x128xf32>
    %14 = arith.maximumf %12, %13 : vector<8x128xf32>
    %c0_12 = arith.constant 0 : index
    %c0_13 = arith.constant 0 : index
    %15 = vector.load %arg6[%c0_12, %c0_13] : memref<128x16xf32, #tpu.memory_space<vmem>>, vector<128x16xf32>
    %c0_14 = arith.constant 0 : index
    %c0_15 = arith.constant 0 : index
    %16 = vector.load %arg7[%c0_14, %c0_15] : memref<1x16xf32, #tpu.memory_space<vmem>>, vector<1x16xf32>
    %cst_16 = arith.constant dense<0.000000e+00> : vector<8x16xf32>
    %17 = tpu.matmul %14, %15, %cst_16 {dimension_numbers = #tpu.dot_dimension_numbers<[1], [0], [0], [1], [0, 0, 1, 1], [], []>} : vector<8x128xf32>, vector<128x16xf32>, vector<8x16xf32> -> vector<8x16xf32>
    %18 = vector.broadcast %16 : vector<1x16xf32> to vector<8x16xf32>
    %19 = arith.addf %17, %18 : vector<8x16xf32>
    %20 = arith.mulf %19, %19 : vector<8x16xf32>
    %cst_17 = arith.constant dense<0.000000e+00> : vector<8xf32>
    %21 = vector.multi_reduction <add>, %20, %cst_17 [1] : vector<8x16xf32> to vector<8xf32>
    %22 = vector.shape_cast %21 : vector<8xf32> to vector<8x1xf32>
    %cst_18 = arith.constant 1.000000e-24 : f32
    %23 = vector.broadcast %cst_18 : f32 to vector<8x1xf32>
    %24 = arith.maximumf %22, %23 : vector<8x1xf32>
    %25 = math.rsqrt %24 : vector<8x1xf32>
    %26 = vector.broadcast %25 : vector<8x1xf32> to vector<8x16xf32>
    %27 = arith.mulf %19, %26 : vector<8x16xf32>
    %c0_19 = arith.constant 0 : index
    %c0_20 = arith.constant 0 : index
    %28 = vector.load %arg8[%c0_19, %c0_20] : memref<8x16xf32, #tpu.memory_space<vmem>>, vector<8x16xf32>
    tpu.vector_store %arg8[%c0_19, %c0_20], %27 {strides = array<i32>} : memref<8x16xf32, #tpu.memory_space<vmem>>, vector<8x16xf32>,
    return
  }
  func.func @transform_0(%arg0: i32) -> (i32, i32) {
    %c0_i32 = arith.constant 0 : i32
    %c0_i32_0 = arith.constant 0 : i32
    return %arg0, %c0_i32 : i32, i32
  }
  func.func @transform_1(%arg0: i32) -> (i32, i32) {
    %c0_i32 = arith.constant 0 : i32
    %c0_i32_0 = arith.constant 0 : i32
    %c0_i32_1 = arith.constant 0 : i32
    return %c0_i32, %c0_i32_0 : i32, i32
  }
  func.func @transform_2(%arg0: i32) -> (i32, i32) {
    %c0_i32 = arith.constant 0 : i32
    %c0_i32_0 = arith.constant 0 : i32
    %c0_i32_1 = arith.constant 0 : i32
    return %c0_i32, %c0_i32_0 : i32, i32
  }
  func.func @transform_3(%arg0: i32) -> (i32, i32) {
    %c0_i32 = arith.constant 0 : i32
    %c0_i32_0 = arith.constant 0 : i32
    %c0_i32_1 = arith.constant 0 : i32
    return %c0_i32, %c0_i32_0 : i32, i32
  }
  func.func @transform_4(%arg0: i32) -> (i32, i32) {
    %c0_i32 = arith.constant 0 : i32
    %c0_i32_0 = arith.constant 0 : i32
    %c0_i32_1 = arith.constant 0 : i32
    return %c0_i32, %c0_i32_0 : i32, i32
  }
  func.func @transform_5(%arg0: i32) -> (i32, i32) {
    %c0_i32 = arith.constant 0 : i32
    %c0_i32_0 = arith.constant 0 : i32
    %c0_i32_1 = arith.constant 0 : i32
    return %c0_i32, %c0_i32_0 : i32, i32
  }
  func.func @transform_6(%arg0: i32) -> (i32, i32) {
    %c0_i32 = arith.constant 0 : i32
    %c0_i32_0 = arith.constant 0 : i32
    %c0_i32_1 = arith.constant 0 : i32
    return %c0_i32, %c0_i32_0 : i32, i32
  }
  func.func @transform_7(%arg0: i32) -> (i32, i32) {
    %c0_i32 = arith.constant 0 : i32
    %c0_i32_0 = arith.constant 0 : i32
    return %arg0, %c0_i32 : i32, i32
  }
}

</mosaic_0001>

<bundles_post_ra>
// kernel: tpu_custom_call.1
= control target key start
LH: loop header
LB: loop body
LE: loop exit
PB: predicated region body
PF: predicated region fallthrough
CT: control target
= control target key end

     0   :  { %12 = vsyncpa [#allocation3], 0  ;;  %s717_s0 = inlined_call_operand.vmem [shape: f32[8,32], index: 0, kind: input, shape index: {}]   ;;  %s718_s1 = inlined_call_operand.hbm [shape: f32[32,128], index: 1, kind: input, shape index: {}]   ;;  %s719_s2 = inlined_call_operand.vmem [shape: f32[1,128], index: 2, kind: input, shape index: {}]   ;;  %s720_s3 = inlined_call_operand.vmem [shape: f32[128,128], index: 3, kind: input, shape index: {}]   ;;  %s721_s4 = inlined_call_operand.vmem [shape: f32[1,128], index: 4, kind: input, shape index: {}]   ;;  %s722_s5 = inlined_call_operand.vmem [shape: f32[128,16], index: 5, kind: input, shape index: {}]   ;;  %s723_s6 = inlined_call_operand.vmem [shape: f32[1,16], index: 6, kind: input, shape index: {}]   ;;  %s724_s7 = inlined_call_operand.hbm [shape: f32[8,16], index: 7, kind: output, shape index: {}]  }
   0x1   :  { %13 = vsyncpa [#allocation4], 0  ;;  %s515_s24 = smov [#allocation2]  }
   0x2   :  { %s21_s25 = sshll.u32 %s515_s24, 4  ;;  %s22_s25 = int_to_ptr.vmem [resolvable:$true] %s21_s25 }
   0x3   :  { %s479_s26 = scalar_lea.vmem %s22_s25, 512  ;;  %p484_p1 = scmp.lt.s32.totalorder %s22_s25, %s22_s25 }
   0x4   :  { %p480_p0 = scmp.ne.s32.totalorder %s22_s25, %s479_s26  ;;  %p485_p2 = scmp.lt.s32.totalorder %s479_s26, %s479_s26 }
   0x6   :  { %p486_p3 = por %p485_p2, %p484_p1 }
   0x8   :  { %p487_p4 = pnand %p486_p3, %p480_p0 }
   0xa   :  { %490 = shalt.err (!%p487_p4)
}
   0xb   :  { %s516_s27 = smov 128   ;;  %s517_s28 = smov 8  }
   0xc   :  { %27 = dma.hbm_to_vmem [thread:$0]  %s718_s1, 512, %s22_s25, [#allocation3], %s516_s27, %s516_s27, %s517_s28  }
   0xd   :  { %511 = dma.done.wait [#allocation3], 512  }
   0xe   :  { %512 = vsyncadd [#allocation3], 4294966784  ;;  %v518_v0 = vmov 0.0   ;;  %vm519_vm0 = vmmov 0   ;;  %v45_v1 = vld [vmem:[#allocation2 + $0x18] sm:$0xff]  ;;  %v44_v2 = vld [vmem:[#allocation2 + $0x10] sm:$0xff] }
   0xf   :  { %382 = vmatprep.subr.mxu0 %v518_v0  ;;  %390 = vmatprep.mubr.msk.f32.mxu0 %vm519_vm0, %v518_v0  ;;  %v143_v3 = vld [vmem:[%s720_s3 + $0x78] sm:$0xff]  ;;  %v43_v4 = vld [vmem:[#allocation2 + $0x8] sm:$0xff]  ;;  %v142_v5 = vld [vmem:[%s720_s3 + $0x70] sm:$0xff]  ;;  %vm53_vm1 = vcmask 261120   ;;  %vm316_vm2 = vcmask 130048  }
  0x10   :  { %393 = vmatprep.subr.mxu1 %v518_v0  ;;  %425 = vmatprep.mubr.msk.f32.mxu1 %vm519_vm0, %v518_v0  ;;  %v141_v6 = vld [vmem:[%s720_s3 + $0x68] sm:$0xff]  ;;  %v42_v7 = vld [vmem:[#allocation2] sm:$0xff]  ;;  %v139_v10 = vld [vmem:[%s720_s3 + $0x58] sm:$0xff] }
  0x11   :  { %383 = vmatpush3.msra.mxu0 %v45_v1  ;;  %394 = vmatpush3.msra.mxu1 %v143_v3  ;;  %v41_v8 = vld [vmem:[%s717_s0] sm:$0xff]  ;;  %v138_v11 = vld [vmem:[%s720_s3 + $0x50] sm:$0xff]  ;;  %v137_v12 = vld [vmem:[%s720_s3 + $0x48] sm:$0xff] }
  0x12   :  { %384 = vmatprep.subr.mxu0 %v518_v0  ;;  %395 = vmatprep.subr.mxu1 %v518_v0  ;;  %v140_v9 = vld [vmem:[%s720_s3 + $0x60] sm:$0xff]  ;;  %v135_v14 = vld [vmem:[%s720_s3 + $0x38] sm:$0xff]  ;;  %v134_v15 = vld [vmem:[%s720_s3 + $0x30] sm:$0xff] }
  0x13   :  { %385 = vmatpush3.msra.mxu0 %v44_v2  ;;  %396 = vmatpush3.msra.mxu1 %v142_v5  ;;  %v136_v13 = vld [vmem:[%s720_s3 + $0x40] sm:$0xff]  ;;  %v133_v16 = vld [vmem:[%s720_s3 + $0x28] sm:$0xff]  ;;  %v131_v18 = vld [vmem:[%s720_s3 + $0x18] sm:$0xff] }
  0x14   :  { %386 = vmatprep.subr.mxu0 %v518_v0  ;;  %397 = vmatprep.subr.mxu1 %v518_v0  ;;  %v132_v17 = vld [vmem:[%s720_s3 + $0x20] sm:$0xff]  ;;  %v130_v19 = vld [vmem:[%s720_s3 + $0x10] sm:$0xff]  ;;  %v129_v20 = vld [vmem:[%s720_s3 + $0x8] sm:$0xff] }
  0x15   :  { %387 = vmatpush3.msra.mxu0 %v43_v4  ;;  %398 = vmatpush3.msra.mxu1 %v141_v6  ;;  %v128_v21 = vld [vmem:[%s720_s3] sm:$0xff]  ;;  %v237_v22 = vld [vmem:[%s722_s5 + $0x78] sm:$0xff]  ;;  %v236_v23 = vld [vmem:[%s722_s5 + $0x70] sm:$0xff] }
  0x16   :  { %388 = vmatprep.subr.mxu0 %v518_v0  ;;  %399 = vmatprep.subr.mxu1 %v518_v0  ;;  %v235_v24 = vld [vmem:[%s722_s5 + $0x68] sm:$0xff]  ;;  %v234_v25 = vld [vmem:[%s722_s5 + $0x60] sm:$0xff]  ;;  %v233_v26 = vld [vmem:[%s722_s5 + $0x58] sm:$0xff] }
  0x17   :  { %389 = vmatpush3.msra.mxu0 %v42_v7  ;;  %400 = vmatpush3.msra.mxu1 %v140_v9  ;;  %v232_v27 = vld [vmem:[%s722_s5 + $0x50] sm:$0xff]  ;;  %v231_v28 = vld [vmem:[%s722_s5 + $0x48] sm:$0xff]  ;;  %v230_v29 = vld [vmem:[%s722_s5 + $0x40] sm:$0xff] }
  0x18   :  { %391 = vmatmul.mubr.msk.f32.vlgmr.msra.gmra.mxu0 %vm53_vm1, %v41_v8  ;;  %401 = vmatprep.subr.mxu1 %v518_v0  ;;  %v229_v30 = vld [vmem:[%s722_s5 + $0x38] sm:$0xff]  ;;  %v228_v31 = vld [vmem:[%s722_s5 + $0x30] sm:$0xff]  ;;  %v227_v32 = vld [vmem:[%s722_s5 + $0x28] sm:$0xff] }
  0x19   :  { %428 = vmatprep.subr.mxu0 %v518_v0  ;;  %402 = vmatpush3.msra.mxu1 %v139_v10  ;;  %v226_v33 = vld [vmem:[%s722_s5 + $0x20] sm:$0xff]  ;;  %v225_v34 = vld [vmem:[%s722_s5 + $0x18] sm:$0xff]  ;;  %v224_v40 = vld [vmem:[%s722_s5 + $0x10] sm:$0xff] }
  0x1a   :  { %460 = vmatprep.mubr.msk.f32.mxu0 %vm519_vm0, %v518_v0  ;;  %403 = vmatprep.subr.mxu1 %v518_v0  ;;  %v339_v35 = vld [vmem:[%s719_s2] ss:$0 sm:$0xff]  ;;  %v223_v41 = vld [vmem:[%s722_s5 + $0x8] sm:$0xff] }
  0x1b   :  { %404 = vmatpush3.msra.mxu1 %v138_v11  ;;  %429 = vmatpush3.msra.mxu0 %v237_v22  ;;  %v222_v42 = vld [vmem:[%s722_s5] sm:$0xff] }
  0x1c   :  { %405 = vmatprep.subr.mxu1 %v518_v0  ;;  %430 = vmatprep.subr.mxu0 %v518_v0  ;;  %v341_v43 = vld [vmem:[%s721_s4] ss:$0 sm:$0xff]  ;;  %s520_s4 = smov [#allocation5]  }
  0x1d   :  { %406 = vmatpush3.msra.mxu1 %v137_v12  ;;  %431 = vmatpush3.msra.mxu0 %v236_v23  ;;  %v342_v48 = vld [vmem:[%s723_s6] ss:$0 sm:$0xff]  ;;  %s330_s5 = sshll.u32 %s520_s4, 4  ;;  %s331_s5 = int_to_ptr.vmem [resolvable:$true] %s330_s5 }
  0x1e   :  { %407 = vmatprep.subr.mxu1 %v518_v0  ;;  %432 = vmatprep.subr.mxu0 %v518_v0  ;;  %s491_s25 = scalar_lea.vmem %s331_s5, 128  ;;  %p496_p6 = scmp.lt.s32.totalorder %s331_s5, %s331_s5 }
  0x1f   :  { %408 = vmatpush3.msra.mxu1 %v136_v13  ;;  %433 = vmatpush3.msra.mxu0 %v235_v24  ;;  %p492_p5 = scmp.ne.s32.totalorder %s331_s5, %s491_s25  ;;  %p497_p7 = scmp.lt.s32.totalorder %s491_s25, %s491_s25 }
  0x20   :  { %409 = vmatprep.subr.mxu1 %v518_v0  ;;  %434 = vmatprep.subr.mxu0 %v518_v0 }
  0x21   :  { %410 = vmatpush3.msra.mxu1 %v135_v14  ;;  %435 = vmatpush3.msra.mxu0 %v234_v25  ;;  %p498_p8 = por %p497_p7, %p496_p6 }
  0x22   :  { %411 = vmatprep.subr.mxu1 %v518_v0  ;;  %436 = vmatprep.subr.mxu0 %v518_v0 }
  0x23   :  { %412 = vmatpush3.msra.mxu1 %v134_v15  ;;  %437 = vmatpush3.msra.mxu0 %v233_v26  ;;  %p499_p9 = pnand %p498_p8, %p492_p5 }
  0x24   :  { %413 = vmatprep.subr.mxu1 %v518_v0  ;;  %438 = vmatprep.subr.mxu0 %v518_v0 }
  0x25   :  { %414 = vmatpush3.msra.mxu1 %v133_v16  ;;  %439 = vmatpush3.msra.mxu0 %v232_v27 }
  0x26   :  { %415 = vmatprep.subr.mxu1 %v518_v0  ;;  %440 = vmatprep.subr.mxu0 %v518_v0 }
  0x27   :  { %416 = vmatpush3.msra.mxu1 %v132_v17  ;;  %441 = vmatpush3.msra.mxu0 %v231_v28 }
  0x28   :  { %417 = vmatprep.subr.mxu1 %v518_v0  ;;  %442 = vmatprep.subr.mxu0 %v518_v0 }
  0x29   :  { %418 = vmatpush3.msra.mxu1 %v131_v18  ;;  %443 = vmatpush3.msra.mxu0 %v230_v29 }
  0x2a   :  { %419 = vmatprep.subr.mxu1 %v518_v0  ;;  %444 = vmatprep.subr.mxu0 %v518_v0 }
  0x2b   :  { %420 = vmatpush3.msra.mxu1 %v130_v19  ;;  %445 = vmatpush3.msra.mxu0 %v229_v30 }
  0x2c   :  { %421 = vmatprep.subr.mxu1 %v518_v0  ;;  %446 = vmatprep.subr.mxu0 %v518_v0 }
  0x2d   :  { %422 = vmatpush3.msra.mxu1 %v129_v20  ;;  %447 = vmatpush3.msra.mxu0 %v228_v31 }
  0x2e   :  { %423 = vmatprep.subr.mxu1 %v518_v0  ;;  %448 = vmatprep.subr.mxu0 %v518_v0 }
  0x2f   :  { %424 = vmatpush3.msra.mxu1 %v128_v21  ;;  %449 = vmatpush3.msra.mxu0 %v227_v32 }
  0x30   :  { %450 = vmatprep.subr.mxu0 %v518_v0 }
  0x31   :  { %451 = vmatpush3.msra.mxu0 %v226_v33 }
  0x32   :  { %452 = vmatprep.subr.mxu0 %v518_v0 }
  0x33   :  { %453 = vmatpush3.msra.mxu0 %v225_v34 }
  0x34   :  { %454 = vmatprep.subr.mxu0 %v518_v0 }
  0x35   :  { %455 = vmatpush3.msra.mxu0 %v224_v40 }
  0x36   :  { %456 = vmatprep.subr.mxu0 %v518_v0 }
  0x37   :  { %457 = vmatpush3.msra.mxu0 %v223_v41 }
  0x38   :  { %458 = vmatprep.subr.mxu0 %v518_v0 }
  0x39   :  { %459 = vmatpush3.msra.mxu0 %v222_v42 }
  0xd8   :  { %v123_v36 = vpop.f32.mrf.mxu0 }
  0xd9   :  { %v124_v37 = vadd.f32 %v339_v35, %v123_v36 }
  0xda   :  { %v392_v38 = vpop.f32.mrf.mxu0 }
  0xdb   :  { %v127_v39 = vmax.f32 %v124_v37, 0.0 }
  0xdd   :  { %426 = vmatmul.mubr.f32.vlgmr.msra.gmra.mxu1 %v127_v39 }
 0x19d   :  { %v217_v44 = vpop.f32.mrf.mxu1 }
 0x19e   :  { %v218_v45 = vadd.f32 %v341_v43, %v217_v44 }
 0x19f   :  { %v427_v46 = vpop.f32.mrf.mxu1 }
 0x1a0   :  { %v221_v47 = vmax.f32 %v218_v45, 0.0 }
 0x1a2   :  { %461 = vmatmul.mubr.f32.vlgmr.msra.gmra.mxu0 %v221_v47 }
 0x262   :  { %v311_v49 = vpop.f32.mrf.mxu0 }
 0x263   :  { %v312_v50 = vadd.f32 %v342_v48, %v311_v49 }
 0x264   :  { %v462_v51 = vpop.f32.mrf.mxu0 }
 0x265   :  { %v315_v52 = vmul.f32 %v312_v50, %v312_v50 }
 0x267   :  { %v317_v53 = vsel %vm316_vm2, %v315_v52, 0.0 }
 0x268   :  { %318 = vadd.xlane.f32.xlu0 %v317_v53 }
 0x2f1   :  { %v319_v54 = vpop.xlane.xlu0 %318 }
 0x2f2   :  { %v320_v55 = vmax.f32 %v319_v54, 1e-24 }
 0x2f4   :  { %469 = vrsqrt.f32 %v320_v55 }
 0x301   :  { %v470_v56 = vpop.eup %469 }
 0x302   :  { %v322_v57 = vmul.f32 %v470_v56, %v312_v50 }
 0x304   :  { %323 = vst.msk [vmem:[#allocation5] sm:$0xff] %vm316_vm2, %v322_v57 }
 0x305   :  { %502 = shalt.err (!%p499_p9)
}
 0x306   :  { %333 = dma.vmem_to_hbm [thread:$0]  %s331_s5, 128, %s724_s7, [#allocation4]  }
 0x307   :  { %513 = dma.done.wait [#allocation4], 128  }
 0x308   :  { %514 = vsyncadd [#allocation4], 4294967168 }
 0x309   :  { %337 = vsyncpa [#allocation3], 1 }
 0x30a   :  { %338 = vsyncpa [#allocation4], 1 }

</bundles_post_ra>
